<compile_context>
chip_gen: v6e
topology: v6e:2x2x1
jax: 0.10.0
libtpu: 0.0.40
codegen_flags: <defaults>
</compile_context>

<pallas_src>
import jax
import jax.numpy as jnp
from jax.experimental import pallas as pl
from jax.experimental.pallas import tpu as pltpu

LANE = 128  # lane-group width; second matmul result lands at lane offset LANE


def fused_kernel(x_ref, y_ref, wcb_ref, out_ref):
    F = x_ref.shape[1]
    x = x_ref[...]
    y = y_ref[...]
    # Static slices of the packed constant: rows 0..F-1 = weights, row F = bias.
    w = wcb_ref[:F, :]          # [F, 2*LANE]   (sublane slice: free)
    b = wcb_ref[F:, :]          # [1, 2*LANE]
    # One MXU push: [B, F] @ [F, 2*LANE] -> [B, 2*LANE].
    z = jax.lax.dot_general(
        x, w,
        dimension_numbers=(((1,), (0,)), ((), ())),
        precision=jax.lax.Precision.HIGHEST,
        preferred_element_type=jnp.float32,
    ) + b
    z1 = z[:, :F]               # lane-aligned at 0 (first lane group)
    z3 = z[:, LANE:LANE + F]    # lane-aligned at 0 (second lane group)
    z2 = z1 + x
    z4 = z3 + x
    w2 = (z2 - y) + z3
    out_ref[...] = (w2 * z4).astype(out_ref.dtype)


def prepare_params(w1, b1, w2, b2):
    """One-time parameter prep (hoisted out of the per-call path).

    w1, w2 are PyTorch-convention [out, in]; biases are [out].
    Returns a single packed operand wcb of shape [F+1, 2*LANE] (f32):
      wcb[:F, :F]            = W1^T
      wcb[:F, LANE:LANE+F]   = W1^T @ W2^T     (so x @ it == fc2(fc1(x)) sans bias)
      wcb[F,  :F]            = b1
      wcb[F,  LANE:LANE+F]   = b1 @ W2^T + b2
    """
    with jax.default_matmul_precision("highest"):
        w1t = w1.T.astype(jnp.float32)                       # [in, out]
        w2t = w2.T.astype(jnp.float32)                       # [in, out]
        w12 = w1t @ w2t
        b12 = b1.astype(jnp.float32) @ w2t + b2.astype(jnp.float32)
    F = w1t.shape[0]
    wcb = jnp.zeros((F + 1, 2 * LANE), jnp.float32)
    wcb = wcb.at[:F, :F].set(w1t)
    wcb = wcb.at[:F, LANE:LANE + F].set(w12)
    wcb = wcb.at[F, :F].set(b1.astype(jnp.float32))
    wcb = wcb.at[F, LANE:LANE + F].set(b12)
    return wcb


@jax.jit
def model_forward(x, y, wcb):
    B, F = x.shape
    vmem = pl.BlockSpec(memory_space=pltpu.MemorySpace.VMEM)
    return pl.pallas_call(
        fused_kernel,
        out_shape=jax.ShapeDtypeStruct((B, F), x.dtype),
        in_specs=[vmem, vmem, vmem],
        out_specs=vmem,
    )(x, y, wcb)


def reference_forward(x, y, w1, b1, w2, b2):
    with jax.default_matmul_precision("highest"):
        z1 = x @ w1.T + b1
        z2 = z1 + x
        z3 = z1 @ w2.T + b2
        z4 = z3 + x
        w1_ = z2 - y
        w2_ = w1_ + z3
        return w2_ * z4


if __name__ == "__main__":
    key = jax.random.PRNGKey(0)
    kx, ky, kw1, kb1, kw2, kb2 = jax.random.split(key, 6)

    B, F = 10, 8
    x = jax.random.uniform(kx, (B, F), dtype=jnp.float32)
    y = jax.random.uniform(ky, (B, F), dtype=jnp.float32)

    # Deterministic Linear(8, 8) init (PyTorch-style uniform(-1/sqrt(in), 1/sqrt(in))).
    bound = 1.0 / jnp.sqrt(jnp.float32(F))
    w1 = jax.random.uniform(kw1, (F, F), minval=-bound, maxval=bound, dtype=jnp.float32)
    b1 = jax.random.uniform(kb1, (F,), minval=-bound, maxval=bound, dtype=jnp.float32)
    w2 = jax.random.uniform(kw2, (F, F), minval=-bound, maxval=bound, dtype=jnp.float32)
    b2 = jax.random.uniform(kb2, (F,), minval=-bound, maxval=bound, dtype=jnp.float32)

    # Hoisted, one-time parameter fusion (single packed operand, f32).
    wcb = jax.block_until_ready(prepare_params(w1, b1, w2, b2))

    out = jax.block_until_ready(model_forward(x, y, wcb))

    ref = reference_forward(x, y, w1, b1, w2, b2)
    assert out.shape == (B, F)
    assert jnp.allclose(out, ref, atol=1e-5, rtol=1e-5)

    print("KERNEL_OK")
</pallas_src>

<mosaic_0001>
module attributes {stable_mosaic.version = 11 : i64} {
  func.func @fused_kernel(%arg0: memref<10x8xf32, #tpu.memory_space<vmem>>, %arg1: memref<10x8xf32, #tpu.memory_space<vmem>>, %arg2: memref<9x256xf32, #tpu.memory_space<vmem>>, %arg3: memref<10x8xf32, #tpu.memory_space<vmem>>) attributes {dimension_semantics = [], scalar_prefetch = 0 : i64, scratch_operands = 0 : i64, tpu.core_type = #tpu.core_type<tc>} {
    %c0 = arith.constant 0 : index
    %c0_0 = arith.constant 0 : index
    %0 = vector.load %arg0[%c0, %c0_0] : memref<10x8xf32, #tpu.memory_space<vmem>>, vector<10x8xf32>
    %c0_1 = arith.constant 0 : index
    %c0_2 = arith.constant 0 : index
    %1 = vector.load %arg1[%c0_1, %c0_2] : memref<10x8xf32, #tpu.memory_space<vmem>>, vector<10x8xf32>
    %c0_3 = arith.constant 0 : index
    %c0_4 = arith.constant 0 : index
    %2 = vector.load %arg2[%c0_3, %c0_4] : memref<9x256xf32, #tpu.memory_space<vmem>>, vector<8x256xf32>
    %c8 = arith.constant 8 : index
    %c0_5 = arith.constant 0 : index
    %3 = vector.load %arg2[%c8, %c0_5] : memref<9x256xf32, #tpu.memory_space<vmem>>, vector<1x256xf32>
    %cst = arith.constant dense<0.000000e+00> : vector<10x256xf32>
    %4 = tpu.matmul %0, %2, %cst {dimension_numbers = #tpu.dot_dimension_numbers<[1], [0], [0], [1], [0, 0, 1, 1], [], []>, precision = #tpu.contract_precision<fp32>} : vector<10x8xf32>, vector<8x256xf32>, vector<10x256xf32> -> vector<10x256xf32>
    %5 = vector.broadcast %3 : vector<1x256xf32> to vector<10x256xf32>
    %6 = arith.addf %4, %5 : vector<10x256xf32>
    %7 = vector.extract_strided_slice %6 {offsets = [0, 0], sizes = [10, 8], strides = [1, 1]} : vector<10x256xf32> to vector<10x8xf32>
    %8 = vector.extract_strided_slice %6 {offsets = [0, 128], sizes = [10, 8], strides = [1, 1]} : vector<10x256xf32> to vector<10x8xf32>
    %9 = arith.addf %7, %0 : vector<10x8xf32>
    %10 = arith.addf %8, %0 : vector<10x8xf32>
    %11 = arith.subf %9, %1 : vector<10x8xf32>
    %12 = arith.addf %11, %8 : vector<10x8xf32>
    %13 = arith.mulf %12, %10 : vector<10x8xf32>
    %c0_6 = arith.constant 0 : index
    %c0_7 = arith.constant 0 : index
    %14 = vector.load %arg3[%c0_6, %c0_7] : memref<10x8xf32, #tpu.memory_space<vmem>>, vector<10x8xf32>
    tpu.vector_store %arg3[%c0_6, %c0_7], %13 {strides = array<i32>} : memref<10x8xf32, #tpu.memory_space<vmem>>, vector<10x8xf32>,
    return
  }
}

</mosaic_0001>

<bundles_post_ra>
// kernel: model_forward.1
= control target key start
LH: loop header
LB: loop body
LE: loop exit
PB: predicated region body
PF: predicated region fallthrough
CT: control target
= control target key end

     0   :  { %vm33_vm0 = vcmask 64512   ;;  %v573_v2 = vmov 0.0   ;;  %v23_v27 = vlaneseq  ;;  %vm565_vm1 = vcmask 58368   ;;  %s634_s2 = inlined_call_operand.vmem [shape: f32[9,256], index: 2, kind: input, shape index: {}]   ;;  %s635_s0 = inlined_call_operand.vmem [shape: f32[10,8], index: 0, kind: input, shape index: {}]   ;;  %s636_s1 = inlined_call_operand.vmem [shape: f32[10,8], index: 1, kind: input, shape index: {}]   ;;  %s637_s3 = inlined_call_operand.vmem [shape: f32[10,8], index: 3, kind: output, shape index: {}]  }
   0x1   :  { %v19_v0 = vld [vmem:[%s634_s2 + $0x8] sm:$0xff]  ;;  %v18_v1 = vld [vmem:[%s634_s2] sm:$0xff]  ;;  %106 = vmatprep.mubr.f32.mxu0 %v573_v2  ;;  %203 = vmatprep.mubr.f32.mxu1 %v573_v2  ;;  %v571_v30 = vld [vmem:[%s634_s2 + $0x10] ss:$8 sm:$0x3] }
   0x2   :  { %v603_v3 = vld [vmem:[%s635_s0] sm:$0xff]  ;;  %v70_v4 = vand.u32 4294901760, %v19_v0  ;;  %v72_v5 = vand.u32 4294901760, %v18_v1  ;;  %v610_v7 = vld [vmem:[%s635_s0 + $0x8] sm:$0x3]  ;;  %v24_v28 = vshrl.u32 %v23_v27, 7 }
   0x3   :  { %v35_v6 = vsel %vm33_vm0, %v603_v3, 0  ;;  %v38_v9 = vsel %vm33_vm0, %v610_v7, 0 }
   0x4   :  { %v107_v8 = vand.u32 4294901760, %v35_v6  ;;  %71 = vmatprep.subr.mxu0 %v70_v4  ;;  %v160_v10 = vsub.f32 %v19_v0, %v70_v4  ;;  %v166_v11 = vsub.f32 %v18_v1, %v72_v5  ;;  %v118_v12 = vand.u32 4294901760, %v38_v9 }
   0x5   :  { %73 = vmatpush1.msra.mxu0 %v72_v5  ;;  %v25_v29 = vsub.s32 0, %v24_v28  ;;  %v29_v31 = vsub.s32 1, %v24_v28 }
   0x6   :  { %v108_v13 = vsub.f32 %v35_v6, %v107_v8  ;;  %v161_v14 = vand.u32 4294901760, %v160_v10  ;;  %250 = vmatprep.subr.mxu0 %v160_v10  ;;  %v167_v15 = vand.u32 4294901760, %v166_v11  ;;  %v119_v16 = vsub.f32 %v38_v9, %v118_v12 }
   0x7   :  { %v26_v33 = vrot.slane %v571_v30, %v25_v29  ;;  %v30_v36 = vrot.slane %v571_v30, %v29_v31 }
   0x8   :  { %v109_v17 = vand.u32 4294901760, %v108_v13  ;;  %v162_v18 = vsub.f32 %v160_v10, %v161_v14  ;;  %v168_v19 = vsub.f32 %v166_v11, %v167_v15  ;;  %v120_v20 = vand.u32 4294901760, %v119_v16  ;;  %v16_v10 = vld [vmem:[%s636_s1] sm:$0xff] }
   0xa   :  { %v110_v21 = vsub.f32 %v108_v13, %v109_v17  ;;  %v163_v22 = vand.u32 4294901760, %v162_v18  ;;  %v169_v23 = vand.u32 4294901760, %v168_v19  ;;  %v121_v24 = vsub.f32 %v119_v16, %v120_v20 }
   0xc   :  { %v111_v25 = vand.u32 4294901760, %v110_v21  ;;  %164 = vmatprep.subr.mxu1 %v163_v22  ;;  %v122_v26 = vand.u32 4294901760, %v121_v24  ;;  %v17_v22 = vld [vmem:[%s636_s1 + $0x8] sm:$0x3] }
   0xd   :  { %170 = vmatpush1.msra.mxu1 %v169_v23 }
   0xe   :  { %112 = vmatmul.mubr.f32.vlgmr.msra.gmra.mxu0 %v111_v25  ;;  %205 = vmatmul.mubr.f32.vlgmr.msra.gmra.mxu1 %v107_v8 }
   0xf   :  { %253 = vmatpush1.msra.mxu0 %v166_v11  ;;  %334 = vmatprep.subr.mxu1 %v70_v4 }
  0x10   :  { %117 = vmatprep.mubr.f32.mxu0 %v573_v2  ;;  %336 = vmatpush1.msra.mxu1 %v72_v5 }
  0x11   :  { %210 = vmatprep.mubr.f32.mxu1 %v573_v2  ;;  %421 = vmatprep.subr.mxu0 %v161_v14 }
  0x12   :  { %123 = vmatmul.mubr.f32.gmra.mxu0 %v122_v26  ;;  %212 = vmatmul.mubr.f32.gmra.mxu1 %v118_v12 }
  0x13   :  { %286 = vmatprep.mubr.f32.mxu0 %v573_v2  ;;  %369 = vmatprep.mubr.f32.mxu1 %v573_v2 }
  0x14   :  { %504 = vmatprep.subr.mxu1 %v70_v4 }
  0x16   :  { %289 = vmatmul.mubr.f32.vlgmr.msra.gmra.mxu0 %v108_v13  ;;  %373 = vmatmul.mubr.f32.vlgmr.msra.gmra.mxu1 %v109_v17 }
  0x17   :  { %425 = vmatpush1.msra.mxu0 %v167_v15  ;;  %506 = vmatpush1.msra.mxu1 %v72_v5 }
  0x18   :  { %294 = vmatprep.mubr.f32.mxu0 %v573_v2  ;;  %378 = vmatprep.mubr.f32.mxu1 %v573_v2 }
  0x1a   :  { %297 = vmatmul.mubr.f32.gmra.mxu0 %v119_v16  ;;  %382 = vmatmul.mubr.f32.gmra.mxu1 %v120_v20 }
  0x1b   :  { %458 = vmatprep.mubr.f32.mxu0 %v573_v2  ;;  %539 = vmatprep.mubr.f32.mxu1 %v573_v2 }
  0x1e   :  { %460 = vmatmul.mubr.f32.vlgmr.msra.gmra.mxu0 %v107_v8  ;;  %541 = vmatmul.mubr.f32.vlgmr.msra.gmra.mxu1 %v107_v8 }
  0x1f   :  { %465 = vmatprep.mubr.f32.mxu0 %v573_v2  ;;  %546 = vmatprep.mubr.f32.mxu1 %v573_v2 }
  0x22   :  { %467 = vmatmul.mubr.f32.gmra.mxu0 %v118_v12  ;;  %548 = vmatmul.mubr.f32.gmra.mxu1 %v118_v12 }
  0xce   :  { %v113_v32 = vpop.f32.mrf.mxu0  ;;  %v206_v34 = vpop.f32.mrf.mxu1 }
  0xcf   :  { %v114_v39 = vadd.f32 %v113_v32, %v26_v33 }
  0xd0   :  { %v115_v35 = vpop.f32.mrf.mxu0  ;;  %v208_v37 = vpop.f32.mrf.mxu1 }
  0xd1   :  { %v116_v42 = vadd.f32 %v115_v35, %v30_v36  ;;  %v207_v45 = vadd.f32 %v206_v34, %v114_v39 }
  0xd2   :  { %v124_v38 = vpop.f32.mrf.mxu0  ;;  %v213_v40 = vpop.f32.mrf.mxu1 }
  0xd3   :  { %v125_v46 = vadd.f32 %v124_v38, %v26_v33  ;;  %v209_v49 = vadd.f32 %v208_v37, %v116_v42 }
  0xd4   :  { %v126_v41 = vpop.f32.mrf.mxu0  ;;  %v215_v43 = vpop.f32.mrf.mxu1 }
  0xd5   :  { %v127_v50 = vadd.f32 %v126_v41, %v30_v36  ;;  %v214_v54 = vadd.f32 %v213_v40, %v125_v46 }
  0xd6   :  { %v290_v44 = vpop.f32.mrf.mxu0  ;;  %v374_v47 = vpop.f32.mrf.mxu1 }
  0xd7   :  { %v291_v51 = vadd.f32 %v290_v44, %v207_v45  ;;  %v216_v58 = vadd.f32 %v215_v43, %v127_v50 }
  0xd8   :  { %v292_v48 = vpop.f32.mrf.mxu0  ;;  %v376_v52 = vpop.f32.mrf.mxu1 }
  0xd9   :  { %v293_v55 = vadd.f32 %v292_v48, %v209_v49  ;;  %v375_v59 = vadd.f32 %v374_v47, %v291_v51 }
  0xda   :  { %v298_v53 = vpop.f32.mrf.mxu0  ;;  %v383_v56 = vpop.f32.mrf.mxu1 }
  0xdb   :  { %v299_v60 = vadd.f32 %v298_v53, %v214_v54  ;;  %v377_v63 = vadd.f32 %v376_v52, %v293_v55 }
  0xdc   :  { %v300_v57 = vpop.f32.mrf.mxu0  ;;  %v385_v61 = vpop.f32.mrf.mxu1 }
  0xdd   :  { %v301_v0 = vadd.f32 %v300_v57, %v216_v58  ;;  %v384_v5 = vadd.f32 %v383_v56, %v299_v60 }
  0xde   :  { %v461_v62 = vpop.f32.mrf.mxu0  ;;  %v542_v2 = vpop.f32.mrf.mxu1 }
  0xdf   :  { %v462_v1 = vadd.f32 %v461_v62, %v375_v59  ;;  %v386_v12 = vadd.f32 %v385_v61, %v301_v0 }
  0xe0   :  { %v463_v4 = vpop.f32.mrf.mxu0  ;;  %v544_v9 = vpop.f32.mrf.mxu1 }
  0xe1   :  { %v543_v6 = vadd.f32 %v542_v2, %v462_v1  ;;  %v464_v8 = vadd.f32 %v463_v4, %v377_v63 }
  0xe2   :  { %v468_v11 = vpop.f32.mrf.mxu0  ;;  %v549_v16 = vpop.f32.mrf.mxu1 }
  0xe3   :  { %v554_v13 = vadd.f32 %v543_v6, %v603_v3  ;;  %v545_v14 = vadd.f32 %v544_v9, %v464_v8  ;;  %v469_v15 = vadd.f32 %v468_v11, %v384_v5 }
  0xe4   :  { %v470_v17 = vpop.f32.mrf.mxu0  ;;  %v551_v21 = vpop.f32.mrf.mxu1 }
  0xe5   :  { %v558_v18 = vsub.f32 %v554_v13, %v16_v10  ;;  %v550_v19 = vadd.f32 %v549_v16, %v469_v15  ;;  %v471_v20 = vadd.f32 %v470_v17, %v386_v12  ;;  %v556_v23 = vadd.f32 %v545_v14, %v603_v3 }
  0xe7   :  { %v560_v24 = vadd.f32 %v558_v18, %v545_v14  ;;  %v555_v25 = vadd.f32 %v550_v19, %v610_v7  ;;  %v552_v26 = vadd.f32 %v551_v21, %v471_v20 }
  0xe9   :  { %v562_v27 = vmul.f32 %v560_v24, %v556_v23  ;;  %v559_v28 = vsub.f32 %v555_v25, %v17_v22  ;;  %v557_v29 = vadd.f32 %v552_v26, %v610_v7 }
  0xeb   :  { %564 = vst.msk [vmem:[%s637_s3] sm:$0xff] %vm33_vm0, %v562_v27  ;;  %v561_v30 = vadd.f32 %v559_v28, %v552_v26 }
  0xed   :  { %v563_v31 = vmul.f32 %v561_v30, %v557_v29 }
  0xef   :  { %566 = vst.msk [vmem:[%s637_s3 + $0x8] sm:$0x3] %vm565_vm1, %v563_v31 }

</bundles_post_ra>
